<compile_context>
chip_gen: v7x
topology: tpu7x:2x2x1
jax: 0.10.0
libtpu: 0.0.40
codegen_flags: <defaults>
</compile_context>

<pallas_src>
import jax
import jax.numpy as jnp
from jax.experimental import pallas as pl
from jax.experimental.pallas import tpu as pltpu
import numpy as np


# -----------------------------------------------------------------------------
# Pallas kernel: y = x * cos + rotate_half(x) * |sin|  (sign baked into sin)
# Blocks are (TS, D_eff); the batch dim is squeezed away by the BlockSpec.
# -----------------------------------------------------------------------------
def _rope_kernel(q_ref, k_ref, cos_ref, sin_ref, qo_ref, ko_ref):
    cos = cos_ref[...]            # (TS, D_eff)
    sin_signed = sin_ref[...]     # (TS, D_eff): even lanes carry -sin, odd +sin

    # Built once per grid step, shared by q and k.
    lane = jax.lax.broadcasted_iota(jnp.int32, cos.shape, 1)
    even = (lane & 1) == 0
    n = cos.shape[1]              # always even (wrap lanes are never selected)

    def apply(x):                 # x: (TS, D_eff)
        fwd = pltpu.roll(x, shift=1, axis=1)      # fwd[..., j] = x[..., j-1]
        bwd = pltpu.roll(x, shift=n - 1, axis=1)  # bwd[..., j] = x[..., j+1]
        # even lane 2i   -> bwd = x[2i+1]  (pairs with -sin)
        # odd  lane 2i+1 -> fwd = x[2i]    (pairs with +sin)
        rot = jnp.where(even, bwd, fwd)
        return x * cos + rot * sin_signed

    qo_ref[...] = apply(q_ref[...]).astype(qo_ref.dtype)
    ko_ref[...] = apply(k_ref[...]).astype(ko_ref.dtype)


# -----------------------------------------------------------------------------
# Helpers
# -----------------------------------------------------------------------------
def _cdiv(a: int, b: int) -> int:
    return (a + b - 1) // b


def _round_up(x: int, m: int) -> int:
    return _cdiv(x, m) * m


def _vmem_budget_bytes() -> int:
    """Generation-aware scoped-VMEM budget."""
    try:
        cap = int(pltpu.get_tpu_info().vmem_capacity_bytes)
    except Exception:
        cap = 64 * 1024 * 1024
    if cap >= 128 * 1024 * 1024:       # v5e / v6e: plenty of headroom
        return 64 * 1024 * 1024
    return 32 * 1024 * 1024            # v7x: 64 MiB physical -> stay modest


def _pick_seq_tile(s_eff_min: int, d_eff: int, itemsize: int, budget: int) -> int:
    """Sequence tile: ~2 MiB per stream block, 6 streams x 2 buffers <= budget,
    and keep the parallel grid axis at extent >= 2 whenever possible."""
    per_block = min(2 * 1024 * 1024, budget // 12)
    ts = max(8, (per_block // (d_eff * itemsize)) // 8 * 8)
    if s_eff_min <= ts:
        if s_eff_min >= 16:
            # Split into (at least) two tiles so both v7x TensorCores get work.
            ts = _round_up(_cdiv(s_eff_min, 2), 8)
        else:
            ts = s_eff_min           # single block == full dims -> always legal
    return ts


# -----------------------------------------------------------------------------
# Wrapper: slice cached tables, make the layout lane-dense, tile (seq, batch)
# with batch innermost (table reuse), and launch.
# -----------------------------------------------------------------------------
def rotary_apply(q, k, cos_cached, sin_signed_cached):
    B, S, D = q.shape
    assert k.shape == (B, S, D)
    assert D % 2 == 0, "rotary dim_model must be even"
    # TODO(synk): seq_dimension=-3 layout (B, S, H, D) is not handled; the
    # module's default seq_dimension=-2 is what this kernel implements.

    dtype = q.dtype
    itemsize = jnp.dtype(dtype).itemsize

    cos = cos_cached[:S].astype(dtype)            # (S, D)
    sin = sin_signed_cached[:S].astype(dtype)     # (S, D), sign baked in

    # ---- lane-dense layout: fold small head dims, pad awkward ones ---------
    if D % 128 == 0:
        fold, D_pad = 1, D
    elif 128 % D == 0:                # e.g. D = 64: two positions per row
        fold, D_pad = 128 // D, D
    else:                             # e.g. D = 48: pad lanes up to 128
        fold, D_pad = 1, _round_up(D, 128)
    D_eff = D_pad * fold
    assert D_eff % 2 == 0             # guarantees the roll wrap lanes are never selected

    # ---- generation-aware block sizing --------------------------------------
    budget = _vmem_budget_bytes()
    s_eff_min = _cdiv(S, fold)
    TS = _pick_seq_tile(s_eff_min, D_eff, itemsize, budget)
    n_seq_tiles = _cdiv(s_eff_min, TS)
    S_eff = n_seq_tiles * TS
    S_pad = S_eff * fold

    # ---- pad to the tiled, lane-dense layout (sliced back after the call) ---
    if D_pad != D:
        q = jnp.pad(q, ((0, 0), (0, 0), (0, D_pad - D)))
        k = jnp.pad(k, ((0, 0), (0, 0), (0, D_pad - D)))
        cos = jnp.pad(cos, ((0, 0), (0, D_pad - D)))
        sin = jnp.pad(sin, ((0, 0), (0, D_pad - D)))
    if S_pad != S:
        q = jnp.pad(q, ((0, 0), (0, S_pad - S), (0, 0)))
        k = jnp.pad(k, ((0, 0), (0, S_pad - S), (0, 0)))
        cos = jnp.pad(cos, ((0, S_pad - S), (0, 0)))
        sin = jnp.pad(sin, ((0, S_pad - S), (0, 0)))

    qf = q.reshape(B, S_eff, D_eff)
    kf = k.reshape(B, S_eff, D_eff)
    cosf = cos.reshape(S_eff, D_eff)
    sinf = sin.reshape(S_eff, D_eff)

    # Grid: sequence tiles outermost ("parallel" -> sharded across v7x TCs),
    # batch innermost ("arbitrary") so the cos/sin block index is constant
    # across consecutive steps and their DMA is skipped after the first one.
    grid = (n_seq_tiles, B)
    blk_x = pl.BlockSpec((None, TS, D_eff), lambda s, b: (b, s, 0))  # batch squeezed
    blk_t = pl.BlockSpec((TS, D_eff), lambda s, b: (s, 0))

    n_elem = B * S_eff * D_eff
    cost = pl.CostEstimate(
        flops=8 * n_elem,
        transcendentals=0,
        bytes_accessed=(4 * n_elem + 2 * S_eff * D_eff) * itemsize,
    )

    qo, ko = pl.pallas_call(
        _rope_kernel,
        out_shape=(jax.ShapeDtypeStruct((B, S_eff, D_eff), dtype),
                   jax.ShapeDtypeStruct((B, S_eff, D_eff), k.dtype)),
        grid=grid,
        in_specs=[blk_x, blk_x, blk_t, blk_t],
        out_specs=(blk_x, blk_x),
        compiler_params=pltpu.CompilerParams(
            dimension_semantics=("parallel", "arbitrary"),
            vmem_limit_bytes=budget,
        ),
        cost_estimate=cost,
    )(qf, kf, cosf, sinf)

    qo = qo.reshape(B, S_pad, D_pad)[:, :S, :D]
    ko = ko.reshape(B, S_pad, D_pad)[:, :S, :D]
    return qo, ko


# -----------------------------------------------------------------------------
# Deterministic "module init": inv_freq + cached tables, exactly as
# RotaryEleutherAI.__init__ (cached seq length = 128).  Also returns the
# sign-baked sin table used by the kernel.
# -----------------------------------------------------------------------------
def make_rotary_tables(dim_model: int, max_seq: int = 128):
    inv_freq = 1.0 / (10000.0 ** (jnp.arange(0, dim_model, 2, dtype=jnp.float32)
                                  / dim_model))                       # (D/2,)
    t = jnp.arange(max_seq, dtype=jnp.float32)                        # (S,)
    freqs = jnp.outer(t, inv_freq)                                    # (S, D/2)
    # einops repeat '... d -> ... (d 2)' == adjacent duplication
    cos_cached = jnp.repeat(jnp.cos(freqs), 2, axis=-1)               # (S, D)
    sin_cached = jnp.repeat(jnp.sin(freqs), 2, axis=-1)               # (S, D)
    sign = jnp.tile(jnp.array([-1.0, 1.0], dtype=jnp.float32), dim_model // 2)
    sin_signed_cached = sin_cached * sign                             # (S, D)
    return cos_cached, sin_cached, sin_signed_cached


# -----------------------------------------------------------------------------
# Pure-JAX reference (mirrors the PyTorch forward).
# -----------------------------------------------------------------------------
def _rotate_half_ref(x):
    x1 = x[..., 0::2]
    x2 = x[..., 1::2]
    return jnp.stack((-x2, x1), axis=-1).reshape(x.shape)


def _rope_ref(x, cos, sin):
    S = x.shape[-2]
    return x * cos[:S] + _rotate_half_ref(x) * sin[:S]


def _check(B, S, D, key):
    kq, kk = jax.random.split(key)
    q = jax.random.normal(kq, (B, S, D), dtype=jnp.float32)
    k = jax.random.normal(kk, (B, S, D), dtype=jnp.float32)
    cos_c, sin_c, sin_signed_c = make_rotary_tables(D, max_seq=128)

    q_out, k_out = rotary_apply(q, k, cos_c, sin_signed_c)
    jax.block_until_ready((q_out, k_out))

    np.testing.assert_allclose(np.asarray(q_out),
                               np.asarray(_rope_ref(q, cos_c, sin_c)),
                               rtol=1e-5, atol=1e-5)
    np.testing.assert_allclose(np.asarray(k_out),
                               np.asarray(_rope_ref(k, cos_c, sin_c)),
                               rtol=1e-5, atol=1e-5)


if __name__ == "__main__":
    key = jax.random.PRNGKey(0)
    k1, k2, k3 = jax.random.split(key, 3)
    _check(B=2, S=8, D=64, key=k1)     # head-dim 64 -> lane-dense fold path
    _check(B=1, S=64, D=128, key=k2)   # already lane-dense -> 2 seq tiles
    _check(B=2, S=16, D=48, key=k3)    # awkward head dim -> padded to 128 lanes
    print("KERNEL_OK")
</pallas_src>

<mosaic_0001>
module attributes {stable_mosaic.version = 11 : i64} {
  func.func @_rope_kernel(%arg0: i32, %arg1: i32, %arg2: memref<1x4x128xf32, #tpu.memory_space<vmem>>, %arg3: memref<1x4x128xf32, #tpu.memory_space<vmem>>, %arg4: memref<4x128xf32, #tpu.memory_space<vmem>>, %arg5: memref<4x128xf32, #tpu.memory_space<vmem>>, %arg6: memref<1x4x128xf32, #tpu.memory_space<vmem>>, %arg7: memref<1x4x128xf32, #tpu.memory_space<vmem>>) attributes {dimension_semantics = [#tpu.dimension_semantics<parallel>, #tpu.dimension_semantics<arbitrary>], iteration_bounds = array<i64: 1, 2>, scalar_prefetch = 0 : i64, scratch_operands = 0 : i64, tpu.core_type = #tpu.core_type<tc>, window_params = [{transform_indices = @transform_0, window_bounds = array<i64: 1, 4, 128>}, {transform_indices = @transform_1, window_bounds = array<i64: 1, 4, 128>}, {transform_indices = @transform_2, window_bounds = array<i64: 4, 128>}, {transform_indices = @transform_3, window_bounds = array<i64: 4, 128>}, {transform_indices = @transform_4, window_bounds = array<i64: 1, 4, 128>}, {transform_indices = @transform_5, window_bounds = array<i64: 1, 4, 128>}]} {
    %c0 = arith.constant 0 : index
    %c0_0 = arith.constant 0 : index
    %0 = vector.load %arg4[%c0, %c0_0] : memref<4x128xf32, #tpu.memory_space<vmem>>, vector<4x128xf32>
    %c0_1 = arith.constant 0 : index
    %c0_2 = arith.constant 0 : index
    %1 = vector.load %arg5[%c0_1, %c0_2] : memref<4x128xf32, #tpu.memory_space<vmem>>, vector<4x128xf32>
    %2 = tpu.iota {dimensions = array<i32: 1>} : vector<4x128xi32>
    %c1_i32 = arith.constant 1 : i32
    %3 = vector.broadcast %c1_i32 : i32 to vector<4x128xi32>
    %4 = arith.andi %2, %3 : vector<4x128xi32>
    %c0_i32 = arith.constant 0 : i32
    %5 = vector.broadcast %c0_i32 : i32 to vector<4x128xi32>
    %6 = arith.cmpi eq, %4, %5 : vector<4x128xi32>
    %c0_3 = arith.constant 0 : index
    %c0_4 = arith.constant 0 : index
    %c0_5 = arith.constant 0 : index
    %7 = vector.load %arg2[%c0_3, %c0_4, %c0_5] : memref<1x4x128xf32, #tpu.memory_space<vmem>>, vector<1x4x128xf32>
    %8 = vector.shape_cast %7 : vector<1x4x128xf32> to vector<4x128xf32>
    %c1_i32_6 = arith.constant 1 : i32
    %9 = tpu.dynamic_rotate %8 by %c1_i32_6 dim 1 : vector<4x128xf32>, i32 -> vector<4x128xf32>
    %c127_i32 = arith.constant 127 : i32
    %10 = tpu.dynamic_rotate %8 by %c127_i32 dim 1 : vector<4x128xf32>, i32 -> vector<4x128xf32>
    %11 = arith.select %6, %10, %9 : vector<4x128xi1>, vector<4x128xf32>
    %12 = arith.mulf %8, %0 : vector<4x128xf32>
    %13 = arith.mulf %11, %1 : vector<4x128xf32>
    %14 = arith.addf %12, %13 : vector<4x128xf32>
    %c0_7 = arith.constant 0 : index
    %c0_8 = arith.constant 0 : index
    %c0_9 = arith.constant 0 : index
    %15 = vector.load %arg6[%c0_7, %c0_8, %c0_9] : memref<1x4x128xf32, #tpu.memory_space<vmem>>, vector<1x4x128xf32>
    %16 = vector.shape_cast %15 : vector<1x4x128xf32> to vector<4x128xf32>
    %17 = vector.shape_cast %14 : vector<4x128xf32> to vector<1x4x128xf32>
    tpu.vector_store %arg6[%c0_7, %c0_8, %c0_9], %17 {strides = array<i32>} : memref<1x4x128xf32, #tpu.memory_space<vmem>>, vector<1x4x128xf32>,
    %c0_10 = arith.constant 0 : index
    %c0_11 = arith.constant 0 : index
    %c0_12 = arith.constant 0 : index
    %18 = vector.load %arg3[%c0_10, %c0_11, %c0_12] : memref<1x4x128xf32, #tpu.memory_space<vmem>>, vector<1x4x128xf32>
    %19 = vector.shape_cast %18 : vector<1x4x128xf32> to vector<4x128xf32>
    %c1_i32_13 = arith.constant 1 : i32
    %20 = tpu.dynamic_rotate %19 by %c1_i32_13 dim 1 : vector<4x128xf32>, i32 -> vector<4x128xf32>
    %c127_i32_14 = arith.constant 127 : i32
    %21 = tpu.dynamic_rotate %19 by %c127_i32_14 dim 1 : vector<4x128xf32>, i32 -> vector<4x128xf32>
    %22 = arith.select %6, %21, %20 : vector<4x128xi1>, vector<4x128xf32>
    %23 = arith.mulf %19, %0 : vector<4x128xf32>
    %24 = arith.mulf %22, %1 : vector<4x128xf32>
    %25 = arith.addf %23, %24 : vector<4x128xf32>
    %c0_15 = arith.constant 0 : index
    %c0_16 = arith.constant 0 : index
    %c0_17 = arith.constant 0 : index
    %26 = vector.load %arg7[%c0_15, %c0_16, %c0_17] : memref<1x4x128xf32, #tpu.memory_space<vmem>>, vector<1x4x128xf32>
    %27 = vector.shape_cast %26 : vector<1x4x128xf32> to vector<4x128xf32>
    %28 = vector.shape_cast %25 : vector<4x128xf32> to vector<1x4x128xf32>
    tpu.vector_store %arg7[%c0_15, %c0_16, %c0_17], %28 {strides = array<i32>} : memref<1x4x128xf32, #tpu.memory_space<vmem>>, vector<1x4x128xf32>,
    return
  }
  func.func @transform_0(%arg0: i32, %arg1: i32) -> (i32, i32, i32) {
    %c0_i32 = arith.constant 0 : i32
    %c0_i32_0 = arith.constant 0 : i32
    return %arg1, %arg0, %c0_i32 : i32, i32, i32
  }
  func.func @transform_1(%arg0: i32, %arg1: i32) -> (i32, i32, i32) {
    %c0_i32 = arith.constant 0 : i32
    %c0_i32_0 = arith.constant 0 : i32
    return %arg1, %arg0, %c0_i32 : i32, i32, i32
  }
  func.func @transform_2(%arg0: i32, %arg1: i32) -> (i32, i32) {
    %c0_i32 = arith.constant 0 : i32
    %c0_i32_0 = arith.constant 0 : i32
    return %arg0, %c0_i32 : i32, i32
  }
  func.func @transform_3(%arg0: i32, %arg1: i32) -> (i32, i32) {
    %c0_i32 = arith.constant 0 : i32
    %c0_i32_0 = arith.constant 0 : i32
    return %arg0, %c0_i32 : i32, i32
  }
  func.func @transform_4(%arg0: i32, %arg1: i32) -> (i32, i32, i32) {
    %c0_i32 = arith.constant 0 : i32
    %c0_i32_0 = arith.constant 0 : i32
    return %arg1, %arg0, %c0_i32 : i32, i32, i32
  }
  func.func @transform_5(%arg0: i32, %arg1: i32) -> (i32, i32, i32) {
    %c0_i32 = arith.constant 0 : i32
    %c0_i32_0 = arith.constant 0 : i32
    return %arg1, %arg0, %c0_i32 : i32, i32, i32
  }
}

</mosaic_0001>

<bundles_post_ra>
// kernel: tpu_custom_call.1
= control target key start
LH: loop header
LB: loop body
LE: loop exit
PB: predicated region body
PF: predicated region fallthrough
CT: control target
= control target key end

     0   :  { %11 = vsyncpa [#allocation3], 0  ;;  %s1143_s0 = inlined_call_operand.hbm [shape: f32[2,4,128], index: 0, kind: input, shape index: {}]   ;;  %s1144_s1 = inlined_call_operand.hbm [shape: f32[2,4,128], index: 1, kind: input, shape index: {}]   ;;  %s1145_s2 = inlined_call_operand.vmem [shape: f32[4,128], index: 2, kind: input, shape index: {}]   ;;  %s1146_s3 = inlined_call_operand.vmem [shape: f32[4,128], index: 3, kind: input, shape index: {}]   ;;  %s1147_s4 = inlined_call_operand.hbm [shape: f32[2,4,128], index: 4, kind: output, shape index: {0}]   ;;  %s1148_s5 = inlined_call_operand.hbm [shape: f32[2,4,128], index: 5, kind: output, shape index: {1}]  }
   0x1   :  { %13 = vsyncpa [#allocation3 + $0x1], 0 }
   0x2   :  { %14 = vsyncpa [#allocation6], 0 }
   0x3   :  { %16 = vsyncpa [#allocation6 + $0x1], 0 }
   0x4   :  { %17 = vsyncpa [#allocation4], 0 }
   0x5   :  { %19 = vsyncpa [#allocation4 + $0x1], 0 }
   0x6   :  { %20 = vsyncpa [#allocation9], 0 }
   0x7   :  { %22 = vsyncpa [#allocation9 + $0x1], 0  ;;  %s882_s18 = smov 0   ;;  %s884_s19 = smov 0  }
   0x8   :  { %s886_s20 = smov 0   ;;  %s888_s21 = smov 0  }
   0x9   :  { %s890_s22 = smov 0   ;;  %s892_s23 = smov 0  }
   0xa LB: > { %s571_s24 = sadd.s32 4294967295, %s844_s23   ;;  %s572_s25 = sadd.s32 4294967294, %s844_s23   ;;  %s844_s23 = sphi %s892_s23, %s28_s23   ;;  %s840_s22 = sphi %s890_s22, %s1168_s22   ;;  %s836_s21 = sphi %s888_s21, %s1167_s21   ;;  %s832_s20 = sphi %s886_s20, %s1166_s20   ;;  %s828_s19 = sphi %s884_s19, %s1165_s19   ;;  %s824_s18 = sphi %s882_s18, %s1164_s18  }
   0xb   : > { %s37_s26 = sadd.s32 1, %s840_s22  ;;  %s49_s27 = sadd.s32 1, %s832_s20 }
   0xc   : > { %p38_p0 = scmp.ge.s32.totalorder %s37_s26, 2  ;;  %p56_p1 = scmp.ne.s32.totalorder %s832_s20, %s828_s19 }
   0xd   : > { %p57_p2 = scmp.eq.s32.totalorder %s844_s23, 0  ;;  %p62_p3 = scmp.ne.s32.totalorder %s828_s19, %s824_s18 }
   0xe   : > { %s1170_s26 = smov (%p38_p0, %s37_s26), 0  ;;  %p63_p5 = scmp.eq.s32.totalorder %s571_s24, 0 }
   0xf   : > { %p923_p4 = por %p57_p2, %p56_p1  ;;  %s44_s29 = ssub.s32 %s840_s22, %s1170_s26 }
  0x10   : > { %p168_p6 = scmp.eq.s32.totalorder %s571_s24, 1  ;;  %p47_p7 = scmp.eq.s32.totalorder %s44_s29, 0 }
  0x11   : > { %p929_p8 = por %p63_p5, %p62_p3  ;;  %p174_p10 = scmp.eq.s32.totalorder %s572_s25, 1 }
  0x12   : > { %p933_p9 = por %p168_p6, %p56_p1  ;;  %p614_p13 = scmp.lt.s32.totalorder %s844_s23, 2 }
  0x13   : > { %s1152_s30 = scalar_select %p929_p8, 1, 0 }
  0x14   : > { %s1153_s6 = scalar_select %p933_p9, 1, 0 }
  0x15   : > { %s938_s7 = scalar_select %p47_p7, %s832_s20, %s49_s27  }
  0x16   : > { %p940_p11 = por %p174_p10, %p62_p3  ;;  %s947_s9 = sand.u32 1, %s832_s20  }
  0x17   : > { %s577_s10 = sshll.u32 %s947_s9, 2  ;;  %s578_s11 = sshll.u32 %s840_s22, 6 }
  0x18   : > { %s1154_s8 = scalar_select %p940_p11, 1, 0 }
  0x19   : > { %s956_s14 = scalar_lea.hbm %s1143_s0, %s578_s11  ;;  %s240_s15 = scalar_lea.vmem [#allocation2], %s577_s10 }
  0x1a   : > { %s248_s16 = sshll.u32 %s240_s15, 4  ;;  %p964_p0 = pnand %p614_p13, %p923_p4  ;;  %s960_s16 = int_to_ptr.vmem [resolvable:$true] %s248_s16 }
  0x1b   : > { %s237_s24 = scalar_lea.sflag [#allocation3], %s947_s9  ;;  %s666_s25 = scalar_lea.hbm %s956_s14, 64 }
  0x1c   : > { %p667_p3 = scmp.ne.s32.totalorder %s956_s14, %s666_s25  ;;  %p668_p5 = pneg %p964_p0 }
  0x1d   : > { %s671_s28 = scalar_lea.hbm %s1143_s0, 128  ;;  %p672_p4 = scmp.lt.u32.totalorder %s956_s14, %s1143_s0 }
  0x1e   : > { %p669_p6 = pnand %p668_p5, %p667_p3  ;;  %p673_p10 = scmp.lt.u32.totalorder %s671_s28, %s666_s25 }
  0x1f   : > { %p675_p12 = scmp.lt.u32.totalorder %s666_s25, %s956_s14 }
  0x20   : > { %p670_p7 = pneg %p669_p6  ;;  %p674_p13 = por %p673_p10, %p672_p4 }
  0x22   : > { %p676_p1 = por %p675_p12, %p674_p13 }
  0x24   : > { %p677_p2 = pnand %p676_p1, %p670_p7 }
  0x26   : > { %680 = shalt.err (!%p677_p2)
}
  0x27   : > { %s681_s15 = scalar_lea.vmem %s960_s16, 64  ;;  %s846_s27 = smov [#allocation2]  }
  0x28   : > { %p682_p3 = scmp.ne.s32.totalorder %s960_s16, %s681_s15  ;;  %s686_s29 = sshll.u32 %s846_s27, 4  ;;  %s687_s29 = int_to_ptr.vmem [resolvable:$false] %s686_s29 }
  0x29   : > { %s688_s12 = scalar_lea.vmem %s687_s29, 128  ;;  %p689_p9 = scmp.lt.s32.totalorder %s960_s16, %s687_s29 }
  0x2a   : > { %p684_p6 = pnand %p682_p3, %p668_p5  ;;  %p690_p4 = scmp.lt.s32.totalorder %s688_s12, %s681_s15 }
  0x2c   : > { %p685_p11 = pneg %p684_p6  ;;  %p691_p10 = por %p690_p4, %p689_p9 }
  0x2e   : > { %p692_p12 = pnand %p691_p10, %p685_p11 }
  0x30   : > { %695 = shalt.err (!%p692_p12)
}
  0x31   : > { %603 = dma.hbm_to_vmem [thread:$0]  (!%p964_p0), %s956_s14, 64, %s960_s16, %s237_s24  }
  0x32   : > { %p1156_p1 = scmp.lt.s32.totalorder %s844_s23, 3  ;;  %p1157_p2 = scmp.ge.s32.totalorder %s844_s23, 1 }
  0x33   : > { %s1009_s15 = scalar_lea.hbm %s1144_s1, %s578_s11  ;;  %s259_s27 = scalar_lea.vmem [#allocation5], %s577_s10 }
  0x34   : > { %p1000_p7 = pnand %p1157_p2, %p1156_p1  ;;  %s267_s29 = sshll.u32 %s259_s27, 4  ;;  %s268_s29 = int_to_ptr.vmem [resolvable:$true] %s267_s29 }
  0x35   : > { %s256_s14 = scalar_lea.sflag [#allocation6], %s947_s9  ;;  %s696_s16 = scalar_lea.hbm %s1009_s15, 64 }
  0x36   : > { %s1158_s25 = scalar_select %p1000_p7, 1, 0 }
  0x37   : > { %p697_p9 = scmp.ne.s32.totalorder %s1009_s15, %s696_s16  ;;  %s701_s11 = scalar_lea.hbm %s1144_s1, 128 }
  0x38   : > { %p702_p3 = scmp.lt.u32.totalorder %s1009_s15, %s1144_s1  ;;  %p703_p6 = scmp.lt.u32.totalorder %s701_s11, %s696_s16 }
  0x39   : > { %p699_p11 = pnand %p697_p9, %p668_p5  ;;  %p705_p10 = scmp.lt.u32.totalorder %s696_s16, %s1009_s15 }
  0x3a   : > { %p704_p4 = por %p703_p6, %p702_p3 }
  0x3b   : > { %p700_p13 = pneg %p699_p11 }
  0x3c   : > { %p706_p12 = por %p705_p10, %p704_p4 }
  0x3e   : > { %p707_p1 = pnand %p706_p12, %p700_p13 }
  0x40   : > { %710 = shalt.err (!%p707_p1)
}
  0x41   : > { %s711_s9 = scalar_lea.vmem %s268_s29, 64  ;;  %s847_s10 = smov [#allocation5]  }
  0x42   : > { %p712_p2 = scmp.ne.s32.totalorder %s268_s29, %s711_s9  ;;  %s716_s27 = sshll.u32 %s847_s10, 4  ;;  %s717_s27 = int_to_ptr.vmem [resolvable:$false] %s716_s27 }
  0x43   : > { %s718_s24 = scalar_lea.vmem %s717_s27, 128  ;;  %p719_p8 = scmp.lt.s32.totalorder %s268_s29, %s717_s27 }
  0x44   : > { %p714_p9 = pnand %p712_p2, %p668_p5  ;;  %p720_p7 = scmp.lt.s32.totalorder %s718_s24, %s711_s9 }
  0x46   : > { %p715_p11 = pneg %p714_p9  ;;  %p721_p3 = por %p720_p7, %p719_p8 }
  0x48   : > { %p722_p6 = pnand %p721_p3, %p715_p11 }
  0x4a   : > { %725 = shalt.err (!%p722_p6)
}
  0x4b   : > { %606 = dma.hbm_to_vmem [thread:$0]  (!%p964_p0), %s1009_s15, 64, %s268_s29, %s256_s14  }
  0x4c   : > { %p1159_p13 = scmp.ne.s32.totalorder %s1158_s25, 0 }
  0x4d   : > { %s1036_s16 = sand.u32 (!%p1159_p13), 1, %s828_s19   ;;  %p1160_p8 = scmp.ne.s32.totalorder (!%p1159_p13), %s1152_s30, 0 }
  0x4e   : > { %276 = sbr.rel (%p1159_p13) target bundleno = 250 (0xfa), region = 36  ;;  %s1039_s12 = sshll.u32 (!%p1159_p13), %s1036_s16, 2 }
  0x4f   : > { %s279_s11 = scalar_lea.sflag (!%p1159_p13), [#allocation3], %s1036_s16  ;;  %s282_s28 = scalar_lea.vmem (!%p1159_p13), [#allocation2], %s1039_s12 }
  0x55   : > { %807 = dma.done.wait (%p1160_p8), %s279_s11, 64  }
  0x56   : > { %809 = vsyncadd (%p1160_p8), %s279_s11, 4294967232  ;;  %s288_s17 = scalar_lea.sflag [#allocation6], %s1036_s16  ;;  %s291_s25 = scalar_lea.vmem [#allocation5], %s1039_s12 }
  0x57   : > { %811 = dma.done.wait (%p1160_p8), %s288_s17, 64  }
  0x58   : > { %813 = vsyncadd (%p1160_p8), %s288_s17, 4294967232  ;;  %v360_v0 = vld [vmem:[%s291_s25] sm:$0xf]  ;;  %v350_v1 = vld [vmem:[%s282_s28] sm:$0xf]  ;;  %s848_s15 = smov 1   ;;  %v346_v2 = vlaneseq }
  0x59   : > { %361 = vrot.lane.b32.xlu1 %v360_v0, %s848_s15  ;;  %351 = vrot.lane.b32.xlu0 %v350_v1, %s848_s15  ;;  %s849_s29 = smov 127   ;;  %v344_v7 = vld [vmem:[%s1145_s2] sm:$0xf]  ;;  %s588_s10 = sshll.u32 %s836_s21, 6 }
  0x5a   : > { %v347_v3 = vand.u32 127, %v346_v2  ;;  %v345_v8 = vld [vmem:[%s1146_s3] sm:$0xf]  ;;  %v366_v9 = vmul.f32 %v360_v0, %v344_v7  ;;  %v356_v10 = vmul.f32 %v350_v1, %v344_v7  ;;  %s328_s27 = scalar_lea.vmem [#allocation7], %s1039_s12  ;;  %s335_s11 = scalar_lea.vmem [#allocation8], %s1039_s12 }
  0x5b   : > { %s390_s24 = sshll.u32 %s328_s27, 4  ;;  %s404_s28 = sshll.u32 %s335_s11, 4  ;;  %s1067_s24 = int_to_ptr.vmem [resolvable:$true] %s390_s24  ;;  %s1074_s28 = int_to_ptr.vmem [resolvable:$true] %s404_s28 }
  0x5c   : > { %v348_v4 = vand.u32 1, %v347_v3  ;;  %s1065_s15 = scalar_lea.hbm %s1147_s4, %s588_s10  ;;  %s1072_s14 = scalar_lea.hbm %s1148_s5, %s588_s10 }
  0x5d   : > { %363 = vrot.lane.b32.xlu1 %v360_v0, %s849_s29  ;;  %353 = vrot.lane.b32.xlu0 %v350_v1, %s849_s29  ;;  %s371_s12 = scalar_lea.sflag [#allocation4], %s1036_s16  ;;  %s726_s13 = scalar_lea.vmem %s1067_s24, 64 }
  0x5e   : > { %vm349_vm0 = vcmp.eq.s32.totalorder %v348_v4, 0  ;;  %p727_p0 = scmp.ne.s32.totalorder %s1067_s24, %s726_s13  ;;  %p1161_p5 = scmp.ne.s32.totalorder %s1153_s6, 0 }
  0x5f   : > { %s850_s30 = smov [#allocation7]  }
  0x60   : > { %p728_p7 = pnand %p727_p0, %p1161_p5  ;;  %s730_s9 = sshll.u32 %s850_s30, 4  ;;  %s731_s9 = int_to_ptr.vmem [resolvable:$false] %s730_s9 }
  0x61   : > { %s732_s17 = scalar_lea.vmem %s731_s9, 128  ;;  %p733_p10 = scmp.lt.s32.totalorder %s1067_s24, %s731_s9 }
  0x62   : > { %p729_p4 = pneg %p728_p7  ;;  %p734_p12 = scmp.lt.s32.totalorder %s732_s17, %s726_s13 }
  0x64   : > { %p735_p1 = por %p734_p12, %p733_p10 }
  0x66   : > { %p736_p2 = pnand %p735_p1, %p729_p4 }
  0xcb   : > { %v362_v5 = vpop.permute.xlu1 %361  ;;  %v352_v6 = vpop.permute.xlu0 %351 }
  0xcf   : > { %v364_v11 = vpop.permute.xlu1 %363  ;;  %v354_v12 = vpop.permute.xlu0 %353 }
  0xd0   : > { %v365_v13 = vsel %vm349_vm0, %v364_v11, %v362_v5  ;;  %v355_v14 = vsel %vm349_vm0, %v354_v12, %v352_v6 }
  0xd1   : > { %v367_v15 = vmul.f32 %v365_v13, %v345_v8  ;;  %v357_v16 = vmul.f32 %v355_v14, %v345_v8 }
  0xd3   : > { %v368_v17 = vadd.f32 %v367_v15, %v366_v9  ;;  %v358_v18 = vadd.f32 %v357_v16, %v356_v10 }
  0xd5   : > { %359 = vst [vmem:[%s328_s27] sm:$0xf] %v358_v18  ;;  %369 = vst [vmem:[%s335_s11] sm:$0xf] %v368_v17 }
  0xd6   : > { %739 = shalt.err (!%p736_p2)
}
  0xd7   : > { %s740_s10 = scalar_lea.hbm %s1065_s15, 64  ;;  %s744_s25 = scalar_lea.hbm %s1147_s4, 128 }
  0xd8   : > { %p741_p9 = scmp.ne.s32.totalorder %s1065_s15, %s740_s10  ;;  %p745_p6 = scmp.lt.u32.totalorder %s1065_s15, %s1147_s4 }
  0xd9   : > { %p746_p13 = scmp.lt.u32.totalorder %s744_s25, %s740_s10  ;;  %p748_p0 = scmp.lt.u32.totalorder %s740_s10, %s1065_s15 }
  0xda   : > { %p742_p11 = pnand %p741_p9, %p1161_p5 }
  0xdb   : > { %p747_p8 = por %p746_p13, %p745_p6 }
  0xdc   : > { %p743_p3 = pneg %p742_p11 }
  0xdd   : > { %p749_p7 = por %p748_p0, %p747_p8 }
  0xdf   : > { %p750_p4 = pnand %p749_p7, %p743_p3 }
  0xe1   : > { %753 = shalt.err (!%p750_p4)
}
  0xe2   : > { %596 = dma.vmem_to_hbm [thread:$0]  (%p1161_p5), %s1067_s24, 64, %s1065_s15, %s371_s12  }
  0xe3   : > { %s376_s13 = scalar_lea.sflag [#allocation9], %s1036_s16  ;;  %s754_s30 = scalar_lea.vmem %s1074_s28, 64 }
  0xe4   : > { %p755_p10 = scmp.ne.s32.totalorder %s1074_s28, %s754_s30  ;;  %s851_s9 = smov [#allocation8]  }
  0xe5   : > { %s758_s17 = sshll.u32 %s851_s9, 4  ;;  %s759_s17 = int_to_ptr.vmem [resolvable:$false] %s758_s17 }
  0xe6   : > { %p756_p12 = pnand %p755_p10, %p1161_p5  ;;  %s760_s10 = scalar_lea.vmem %s759_s17, 128 }
  0xe7   : > { %p761_p2 = scmp.lt.s32.totalorder %s1074_s28, %s759_s17  ;;  %p762_p9 = scmp.lt.s32.totalorder %s760_s10, %s754_s30 }
  0xe8   : > { %p757_p1 = pneg %p756_p12 }
  0xe9   : > { %p763_p11 = por %p762_p9, %p761_p2 }
  0xeb   : > { %p764_p3 = pnand %p763_p11, %p757_p1 }
  0xed   : > { %767 = shalt.err (!%p764_p3)
}
  0xee   : > { %s768_s16 = scalar_lea.hbm %s1072_s14, 64  ;;  %s772_s12 = scalar_lea.hbm %s1148_s5, 128 }
  0xef   : > { %p769_p6 = scmp.ne.s32.totalorder %s1072_s14, %s768_s16  ;;  %p773_p0 = scmp.lt.u32.totalorder %s1072_s14, %s1148_s5 }
  0xf0   : > { %p774_p7 = scmp.lt.u32.totalorder %s772_s12, %s768_s16  ;;  %p776_p10 = scmp.lt.u32.totalorder %s768_s16, %s1072_s14 }
  0xf1   : > { %p770_p13 = pnand %p769_p6, %p1161_p5 }
  0xf2   : > { %p775_p4 = por %p774_p7, %p773_p0 }
  0xf3   : > { %p771_p8 = pneg %p770_p13 }
  0xf4   : > { %p777_p12 = por %p776_p10, %p775_p4 }
  0xf6   : > { %p778_p1 = pnand %p777_p12, %p771_p8 }
  0xf8   : > { %781 = shalt.err (!%p778_p1)
}
  0xf9   : > { %597 = dma.vmem_to_hbm [thread:$0]  (%p1161_p5), %s1074_s28, 64, %s1072_s14, %s376_s13  }
  0xfa PF: > { %s416_s25 = sand.u32 1, %s824_s18   ;;  %p1162_p2 = scmp.ne.s32.totalorder %s1154_s8, 0 }
  0xfb   : > { %p1163_p9 = scmp.ge.s32.totalorder %s844_s23, 2  ;;  %s417_s21 = scalar_lea.sflag [#allocation4], %s416_s25 }
  0xfd   : > { %p608_p11 = pnand %p1163_p9, %p1162_p2 }
  0xff   : > { %815 = dma.done.wait (!%p608_p11), %s417_s21, 64  }
 0x100   : > { %817 = vsyncadd (!%p608_p11), %s417_s21, 4294967232  ;;  %s426_s29 = scalar_lea.sflag [#allocation9], %s416_s25 }
 0x101   : > { %819 = dma.done.wait (!%p608_p11), %s426_s29, 64  }
 0x102   : > { %821 = vsyncadd (!%p608_p11), %s426_s29, 4294967232  ;;  %s28_s23 = sadd.s32 1, %s844_s23   ;;  %s1164_s18 = smov %s828_s19 }
 0x103   : > { %p25_p3 = scmp.ge.s32.totalorder %s28_s23, 4   ;;  %s1165_s19 = smov %s832_s20 }
 0x104   : > { %s1166_s20 = smov %s938_s7  ;;  %s1167_s21 = smov %s840_s22 }
 0x105   : > { %s1168_s22 = smov %s1170_s26  ;;  %27 = sbr.rel (!%p25_p3) target bundleno = 10 (0xa), region = 117 }
 0x10c   :  { %431 = vsyncpa [#allocation3], 1 }
 0x10d   :  { %433 = vsyncpa [#allocation3 + $0x1], 1 }
 0x10e   :  { %434 = vsyncpa [#allocation6], 1 }
 0x10f   :  { %436 = vsyncpa [#allocation6 + $0x1], 1 }
 0x110   :  { %437 = vsyncpa [#allocation4], 1 }
 0x111   :  { %439 = vsyncpa [#allocation4 + $0x1], 1 }
 0x112   :  { %440 = vsyncpa [#allocation9], 1 }
 0x113   :  { %442 = vsyncpa [#allocation9 + $0x1], 1 }

</bundles_post_ra>
